<compile_context>
chip_gen: v5e
topology: v5e:2x2
jax: 0.10.0
libtpu: 0.0.40
codegen_flags: <defaults>
</compile_context>

<pallas_src>
import functools

import jax
import jax.numpy as jnp
from jax.experimental import pallas as pl
from jax.experimental.pallas import tpu as pltpu

KSIZE = 64
STRIDE = 32
PAD = (KSIZE - STRIDE) // 2  # 16
OUT_CH = 64


def _conv_kernel(x_ref, w_ref, b_ref, o_ref):
    """One grid step processes `bt` batch elements.

    x_ref : (bt, C, Tb, 32)  padded signal as contiguous 32-sample blocks
    w_ref : (C, 128, 32)     fused filter; rows 0:64 = taps[0:32],
                             rows 64:128 = taps[32:64] (per output channel)
    b_ref : (64, 1)          bias
    o_ref : (bt, 64, T_out)  channel-major (PyTorch) layout
    """
    bt, c = x_ref.shape[0], x_ref.shape[1]
    t_out = o_ref.shape[2]
    for b in range(bt):                       # static unroll, bt <= 8
        p = None
        for ci in range(c):                   # static unroll, C is small
            # 'ok,tk->ot' == A @ B^T: standard MXU pattern; result is already
            # channel-major (out-channel on sublanes, time blocks on lanes).
            contrib = jnp.einsum(
                "ok,tk->ot", w_ref[ci], x_ref[b, ci],
                preferred_element_type=jnp.float32)
            p = contrib if p is None else p + contrib            # (128, Tb)
        # out[:, t] = taps[0:32]·block[t] + taps[32:64]·block[t+1] + bias
        acc = (p[0:OUT_CH, 0:t_out]
               + p[OUT_CH:2 * OUT_CH, 1:t_out + 1]
               + b_ref[...])                                     # (64, T_out)
        o_ref[b] = acc.astype(o_ref.dtype)


def _pick_batch_tile(n):
    # Amortize per-grid-step overhead, but keep >=2 grid steps when possible
    # so both TensorCores stay busy on megacore parts (v7x).
    limit = min(8, max(1, n // 2))
    for d in range(limit, 0, -1):
        if n % d == 0:
            return d
    return 1


@functools.partial(jax.jit, static_argnames=("compute_dtype",))
def input_module_forward(x, weight, bias, *, compute_dtype=jnp.float32):
    """x: (N, C, T); weight: (64, C, 1, 64); bias: (64,). Returns (N, 64, T//32)."""
    n, c, t = x.shape
    assert t % STRIDE == 0, "T must be a multiple of 32 for this kernel"
    t_out = t // STRIDE
    tb = t_out + 1                  # number of 32-sample blocks after padding
    bt = _pick_batch_tile(n)

    # --- input prep: one pad pass + a contiguous (free) reshape; no transposes.
    # TODO(synk): drop jnp.pad and handle the 16-sample halo in-kernel (masked
    # first/last window) to remove the remaining extra HBM pass over x.
    x_blk = jnp.pad(x, ((0, 0), (0, 0), (PAD, PAD))).reshape(n, c, tb, STRIDE)
    x_blk = x_blk.astype(compute_dtype)

    # --- fused, pre-transposed filter (tiny; done once on the XLA side).
    w = jnp.transpose(weight[:, :, 0, :], (1, 0, 2))                    # (C, 64, 64)
    wf = jnp.concatenate([w[:, :, :STRIDE], w[:, :, STRIDE:]], axis=1)  # (C, 128, 32)
    wf = wf.astype(compute_dtype)
    b2d = bias.reshape(OUT_CH, 1).astype(jnp.float32)

    # TODO(synk): for very long T add a T-tile grid axis (with a 1-block halo)
    # so the per-step x block fits v7x's 64 MiB VMEM / v5e's scoped default.
    return pl.pallas_call(
        _conv_kernel,
        out_shape=jax.ShapeDtypeStruct((n, OUT_CH, t_out), x.dtype),
        grid=(n // bt,),
        in_specs=[
            pl.BlockSpec((bt, c, tb, STRIDE), lambda i: (i, 0, 0, 0)),
            pl.BlockSpec((c, 2 * OUT_CH, STRIDE), lambda i: (0, 0, 0)),
            pl.BlockSpec((OUT_CH, 1), lambda i: (0, 0)),
        ],
        out_specs=pl.BlockSpec((bt, OUT_CH, t_out), lambda i: (i, 0, 0)),
        compiler_params=pltpu.CompilerParams(
            dimension_semantics=("parallel",),
            vmem_limit_bytes=32 * 1024 * 1024,
        ),
    )(x_blk, wf, b2d)


def _reference_conv(x, weight, bias):
    """Pure-JAX reference of the PyTorch forward (for validation)."""
    x4 = x[:, :, None, :]                                        # (N, C, 1, T)
    out = jax.lax.conv_general_dilated(
        x4, weight,
        window_strides=(1, STRIDE),
        padding=((0, 0), (PAD, PAD)),
        dimension_numbers=("NCHW", "OIHW", "NCHW"))
    out = out + bias.reshape(1, OUT_CH, 1, 1)
    return out[:, :, 0, :]                                       # (N, 64, T_out)


if __name__ == "__main__":
    num_channels = 4
    N, T = 2, 256                   # T_out = 8

    key = jax.random.PRNGKey(0)
    kx, kw, kb = jax.random.split(key, 3)
    x = jax.random.normal(kx, (N, num_channels, T), dtype=jnp.float32)
    # deterministic parameter init (Conv2d weight (64, C, 1, 64), bias (64,))
    fan_in = num_channels * 1 * KSIZE
    bound = 1.0 / (fan_in ** 0.5)
    weight = jax.random.uniform(kw, (OUT_CH, num_channels, 1, KSIZE),
                                minval=-bound, maxval=bound, dtype=jnp.float32)
    bias = jax.random.uniform(kb, (OUT_CH,),
                              minval=-bound, maxval=bound, dtype=jnp.float32)

    out = jax.block_until_ready(input_module_forward(x, weight, bias))
    ref = jax.block_until_ready(_reference_conv(x, weight, bias))

    assert out.shape == (N, OUT_CH, T // STRIDE), out.shape
    max_err = float(jnp.max(jnp.abs(out - ref)))
    assert jnp.allclose(out, ref, atol=1e-4, rtol=1e-4), max_err

    print("KERNEL_OK")
</pallas_src>

<mosaic_0001>
module attributes {stable_mosaic.version = 11 : i64} {
  func.func @_conv_kernel(%arg0: i32, %arg1: memref<1x4x9x32xf32, #tpu.memory_space<vmem>>, %arg2: memref<4x128x32xf32, #tpu.memory_space<vmem>>, %arg3: memref<64x1xf32, #tpu.memory_space<vmem>>, %arg4: memref<1x64x8xf32, #tpu.memory_space<vmem>>) attributes {dimension_semantics = [#tpu.dimension_semantics<parallel>], iteration_bounds = array<i64: 2>, scalar_prefetch = 0 : i64, scratch_operands = 0 : i64, tpu.core_type = #tpu.core_type<tc>, window_params = [{transform_indices = @transform_0, window_bounds = array<i64: 1, 4, 9, 32>}, {pipeline_mode = #tpu.pipeline_mode<synchronous>, transform_indices = @transform_1, window_bounds = array<i64: 4, 128, 32>}, {pipeline_mode = #tpu.pipeline_mode<synchronous>, transform_indices = @transform_2, window_bounds = array<i64: 64, 1>}, {transform_indices = @transform_3, window_bounds = array<i64: 1, 64, 8>}]} {
    %c0 = arith.constant 0 : index
    %c0_0 = arith.constant 0 : index
    %c0_1 = arith.constant 0 : index
    %0 = vector.load %arg2[%c0, %c0_0, %c0_1] : memref<4x128x32xf32, #tpu.memory_space<vmem>>, vector<1x128x32xf32>
    %1 = vector.shape_cast %0 : vector<1x128x32xf32> to vector<128x32xf32>
    %c0_2 = arith.constant 0 : index
    %c0_3 = arith.constant 0 : index
    %c0_4 = arith.constant 0 : index
    %c0_5 = arith.constant 0 : index
    %2 = vector.load %arg1[%c0_2, %c0_3, %c0_4, %c0_5] : memref<1x4x9x32xf32, #tpu.memory_space<vmem>>, vector<1x1x9x32xf32>
    %3 = vector.shape_cast %2 : vector<1x1x9x32xf32> to vector<9x32xf32>
    "tpu.trace_start"() <{level = 10 : i32, message = "ok,tk->ot"}> : () -> ()
    %cst = arith.constant dense<0.000000e+00> : vector<128x9xf32>
    %4 = tpu.matmul %1, %3, %cst {dimension_numbers = #tpu.dot_dimension_numbers<[1], [1], [0], [0], [0, 0, 1, 0], [], []>} : vector<128x32xf32>, vector<9x32xf32>, vector<128x9xf32> -> vector<128x9xf32>
    "tpu.trace_stop"() : () -> ()
    %c1 = arith.constant 1 : index
    %c0_6 = arith.constant 0 : index
    %c0_7 = arith.constant 0 : index
    %5 = vector.load %arg2[%c1, %c0_6, %c0_7] : memref<4x128x32xf32, #tpu.memory_space<vmem>>, vector<1x128x32xf32>
    %6 = vector.shape_cast %5 : vector<1x128x32xf32> to vector<128x32xf32>
    %c0_8 = arith.constant 0 : index
    %c1_9 = arith.constant 1 : index
    %c0_10 = arith.constant 0 : index
    %c0_11 = arith.constant 0 : index
    %7 = vector.load %arg1[%c0_8, %c1_9, %c0_10, %c0_11] : memref<1x4x9x32xf32, #tpu.memory_space<vmem>>, vector<1x1x9x32xf32>
    %8 = vector.shape_cast %7 : vector<1x1x9x32xf32> to vector<9x32xf32>
    "tpu.trace_start"() <{level = 10 : i32, message = "ok,tk->ot"}> : () -> ()
    %cst_12 = arith.constant dense<0.000000e+00> : vector<128x9xf32>
    %9 = tpu.matmul %6, %8, %cst_12 {dimension_numbers = #tpu.dot_dimension_numbers<[1], [1], [0], [0], [0, 0, 1, 0], [], []>} : vector<128x32xf32>, vector<9x32xf32>, vector<128x9xf32> -> vector<128x9xf32>
    "tpu.trace_stop"() : () -> ()
    %10 = arith.addf %4, %9 : vector<128x9xf32>
    %c2 = arith.constant 2 : index
    %c0_13 = arith.constant 0 : index
    %c0_14 = arith.constant 0 : index
    %11 = vector.load %arg2[%c2, %c0_13, %c0_14] : memref<4x128x32xf32, #tpu.memory_space<vmem>>, vector<1x128x32xf32>
    %12 = vector.shape_cast %11 : vector<1x128x32xf32> to vector<128x32xf32>
    %c0_15 = arith.constant 0 : index
    %c2_16 = arith.constant 2 : index
    %c0_17 = arith.constant 0 : index
    %c0_18 = arith.constant 0 : index
    %13 = vector.load %arg1[%c0_15, %c2_16, %c0_17, %c0_18] : memref<1x4x9x32xf32, #tpu.memory_space<vmem>>, vector<1x1x9x32xf32>
    %14 = vector.shape_cast %13 : vector<1x1x9x32xf32> to vector<9x32xf32>
    "tpu.trace_start"() <{level = 10 : i32, message = "ok,tk->ot"}> : () -> ()
    %cst_19 = arith.constant dense<0.000000e+00> : vector<128x9xf32>
    %15 = tpu.matmul %12, %14, %cst_19 {dimension_numbers = #tpu.dot_dimension_numbers<[1], [1], [0], [0], [0, 0, 1, 0], [], []>} : vector<128x32xf32>, vector<9x32xf32>, vector<128x9xf32> -> vector<128x9xf32>
    "tpu.trace_stop"() : () -> ()
    %16 = arith.addf %10, %15 : vector<128x9xf32>
    %c3 = arith.constant 3 : index
    %c0_20 = arith.constant 0 : index
    %c0_21 = arith.constant 0 : index
    %17 = vector.load %arg2[%c3, %c0_20, %c0_21] : memref<4x128x32xf32, #tpu.memory_space<vmem>>, vector<1x128x32xf32>
    %18 = vector.shape_cast %17 : vector<1x128x32xf32> to vector<128x32xf32>
    %c0_22 = arith.constant 0 : index
    %c3_23 = arith.constant 3 : index
    %c0_24 = arith.constant 0 : index
    %c0_25 = arith.constant 0 : index
    %19 = vector.load %arg1[%c0_22, %c3_23, %c0_24, %c0_25] : memref<1x4x9x32xf32, #tpu.memory_space<vmem>>, vector<1x1x9x32xf32>
    %20 = vector.shape_cast %19 : vector<1x1x9x32xf32> to vector<9x32xf32>
    "tpu.trace_start"() <{level = 10 : i32, message = "ok,tk->ot"}> : () -> ()
    %cst_26 = arith.constant dense<0.000000e+00> : vector<128x9xf32>
    %21 = tpu.matmul %18, %20, %cst_26 {dimension_numbers = #tpu.dot_dimension_numbers<[1], [1], [0], [0], [0, 0, 1, 0], [], []>} : vector<128x32xf32>, vector<9x32xf32>, vector<128x9xf32> -> vector<128x9xf32>
    "tpu.trace_stop"() : () -> ()
    %22 = arith.addf %16, %21 : vector<128x9xf32>
    %23 = vector.extract_strided_slice %22 {offsets = [0, 0], sizes = [64, 8], strides = [1, 1]} : vector<128x9xf32> to vector<64x8xf32>
    %24 = vector.extract_strided_slice %22 {offsets = [64, 1], sizes = [64, 8], strides = [1, 1]} : vector<128x9xf32> to vector<64x8xf32>
    %25 = arith.addf %23, %24 : vector<64x8xf32>
    %c0_27 = arith.constant 0 : index
    %c0_28 = arith.constant 0 : index
    %26 = vector.load %arg3[%c0_27, %c0_28] : memref<64x1xf32, #tpu.memory_space<vmem>>, vector<64x1xf32>
    %27 = vector.broadcast %26 : vector<64x1xf32> to vector<64x8xf32>
    %28 = arith.addf %25, %27 : vector<64x8xf32>
    %c0_29 = arith.constant 0 : index
    %c0_30 = arith.constant 0 : index
    %c0_31 = arith.constant 0 : index
    %29 = vector.load %arg4[%c0_29, %c0_30, %c0_31] : memref<1x64x8xf32, #tpu.memory_space<vmem>>, vector<1x64x8xf32>
    %30 = vector.shape_cast %29 : vector<1x64x8xf32> to vector<64x8xf32>
    %31 = vector.shape_cast %28 : vector<64x8xf32> to vector<1x64x8xf32>
    tpu.vector_store %arg4[%c0_29, %c0_30, %c0_31], %31 {strides = array<i32>} : memref<1x64x8xf32, #tpu.memory_space<vmem>>, vector<1x64x8xf32>,
    return
  }
  func.func @transform_0(%arg0: i32) -> (i32, i32, i32, i32) {
    %c0_i32 = arith.constant 0 : i32
    %c0_i32_0 = arith.constant 0 : i32
    %c0_i32_1 = arith.constant 0 : i32
    %c0_i32_2 = arith.constant 0 : i32
    return %arg0, %c0_i32, %c0_i32_0, %c0_i32_1 : i32, i32, i32, i32
  }
  func.func @transform_1(%arg0: i32) -> (i32, i32, i32) {
    %c0_i32 = arith.constant 0 : i32
    %c0_i32_0 = arith.constant 0 : i32
    %c0_i32_1 = arith.constant 0 : i32
    %c0_i32_2 = arith.constant 0 : i32
    return %c0_i32, %c0_i32_0, %c0_i32_1 : i32, i32, i32
  }
  func.func @transform_2(%arg0: i32) -> (i32, i32) {
    %c0_i32 = arith.constant 0 : i32
    %c0_i32_0 = arith.constant 0 : i32
    %c0_i32_1 = arith.constant 0 : i32
    return %c0_i32, %c0_i32_0 : i32, i32
  }
  func.func @transform_3(%arg0: i32) -> (i32, i32, i32) {
    %c0_i32 = arith.constant 0 : i32
    %c0_i32_0 = arith.constant 0 : i32
    %c0_i32_1 = arith.constant 0 : i32
    return %arg0, %c0_i32, %c0_i32_0 : i32, i32, i32
  }
}

</mosaic_0001>

<bundles_post_ra>
// kernel: input_module_forward.1
= control target key start
LH: loop header
LB: loop body
LE: loop exit
PB: predicated region body
PF: predicated region fallthrough
CT: control target
= control target key end

     0   :  { %s1100_s12 = smov 0   ;;  %s1462_s0 = inlined_call_operand.vmem [shape: f32[2,4,9,32], index: 0, kind: input, shape index: {}]   ;;  %s1463_s1 = inlined_call_operand.vmem [shape: f32[4,128,32], index: 1, kind: input, shape index: {}]   ;;  %s1464_s2 = inlined_call_operand.vmem [shape: f32[64,1], index: 2, kind: input, shape index: {}]   ;;  %s1465_s3 = inlined_call_operand.vmem [shape: f32[2,64,8], index: 3, kind: output, shape index: {}]  }
   0x1 LB: > { %s918_s13 = sadd.s32 4294967295, %s1076_s12   ;;  %p922_p0 = scmp.ge.s32.totalorder %s1076_s12, 1  ;;  %s1076_s12 = sphi %s1100_s12, %s13_s12  }
   0x2   : > { %p137_p1 = scmp.lt.s32.totalorder %s1076_s12, 3 }
   0x4   : > { %p138_p2 = pnand %p922_p0, %p137_p1 }
   0x5   : > { %p161_p3 = scmp.lt.s32.totalorder (!%p138_p2), %s918_s13, 1  ;;  %s1079_s9 = smov (!%p138_p2), 127  }
   0x6   : > { %141 = sbr.rel (%p138_p2) target bundleno = 404 (0x194), region = 32 }
   0xb   : > { %s1467_s13 = smov (!%p161_p3, %s918_s13), 1  ;;  %vm209_vm0 = vcmask 261120   ;;  %v981_v8 = vld [vmem:[%s1463_s1 + $0x100] sm:$0xff]  ;;  %v982_v12 = vld [vmem:[%s1463_s1 + $0x108] sm:$0xff]  ;;  %v983_v16 = vld [vmem:[%s1463_s1 + $0x110] sm:$0xff]  ;;  %vm854_vm1 = vcmask 64512  }
   0xc   : > { %s1055_s14 = sshll.u32 %s1467_s13, 6  ;;  %v1017_v9 = vld [vmem:[%s1463_s1 + $0x180] sm:$0xff]  ;;  %v1018_v13 = vld [vmem:[%s1463_s1 + $0x188] sm:$0xff]  ;;  %v1019_v17 = vld [vmem:[%s1463_s1 + $0x190] sm:$0xff] }
   0xd   : > { %s165_s17 = scalar_lea.vmem %s1462_s0, %s1055_s14  ;;  %v927_v10 = vld [vmem:[%s1463_s1 + $0x80] sm:$0xff]  ;;  %v928_v14 = vld [vmem:[%s1463_s1 + $0x88] sm:$0xff]  ;;  %v929_v18 = vld [vmem:[%s1463_s1 + $0x90] sm:$0xff]  ;;  %s1434_s21 = scalar_lea.vmem %s1465_s3, %s1055_s14 }
   0xe   : > { %v998_v0 = vld [vmem:[%s165_s17 + $0x28] sm:$0x1]  ;;  %v1034_v1 = vld [vmem:[%s165_s17 + $0x38] sm:$0x1]  ;;  %v997_v4 = vld [vmem:[%s165_s17 + $0x20] sm:$0xff] }
   0xf   : > { %v944_v2 = vld [vmem:[%s165_s17 + $0x18] sm:$0x1]  ;;  %999 = vmatpush.xpose.msk.msra.mxu2 %vm209_vm0, %v998_v0  ;;  %1035 = vmatpush.xpose.msk.msra.mxu3 %vm209_vm0, %v1034_v1  ;;  %v188_v3 = vld [vmem:[%s165_s17 + $0x8] sm:$0x1]  ;;  %v1033_v5 = vld [vmem:[%s165_s17 + $0x30] sm:$0xff] }
  0x10   : > { %945 = vmatpush.xpose.msk.msra.mxu0 %vm209_vm0, %v944_v2  ;;  %963 = vmatpush.xpose.msk.msra.mxu1 %vm209_vm0, %v188_v3  ;;  %v943_v6 = vld [vmem:[%s165_s17 + $0x10] sm:$0xff]  ;;  %v187_v7 = vld [vmem:[%s165_s17] sm:$0xff]  ;;  %v172_v15 = vld [vmem:[%s1463_s1 + $0x8] sm:$0xff] }
  0x11   : > { %v171_v11 = vld [vmem:[%s1463_s1] sm:$0xff]  ;;  %v173_v19 = vld [vmem:[%s1463_s1 + $0x10] sm:$0xff]  ;;  %v984_v20 = vld [vmem:[%s1463_s1 + $0x118] sm:$0xff] }
  0x12   : > { %v1020_v21 = vld [vmem:[%s1463_s1 + $0x198] sm:$0xff]  ;;  %v985_v24 = vld [vmem:[%s1463_s1 + $0x120] sm:$0xff]  ;;  %v986_v28 = vld [vmem:[%s1463_s1 + $0x128] sm:$0xff] }
  0x13   : > { %1000 = vmatpush.xpose.msk.msra.mxu2 %vm209_vm0, %v997_v4  ;;  %1036 = vmatpush.xpose.msk.msra.mxu3 %vm209_vm0, %v1033_v5  ;;  %v930_v22 = vld [vmem:[%s1463_s1 + $0x98] sm:$0xff]  ;;  %v1021_v25 = vld [vmem:[%s1463_s1 + $0x1a0] sm:$0xff]  ;;  %v1022_v29 = vld [vmem:[%s1463_s1 + $0x1a8] sm:$0xff] }
  0x14   : > { %946 = vmatpush.xpose.msk.msra.mxu0 %vm209_vm0, %v943_v6  ;;  %964 = vmatpush.xpose.msk.msra.mxu1 %vm209_vm0, %v187_v7  ;;  %v174_v23 = vld [vmem:[%s1463_s1 + $0x18] sm:$0xff]  ;;  %v931_v26 = vld [vmem:[%s1463_s1 + $0xa0] sm:$0xff]  ;;  %v932_v30 = vld [vmem:[%s1463_s1 + $0xa8] sm:$0xff] }
  0x15   : > { %v175_v27 = vld [vmem:[%s1463_s1 + $0x20] sm:$0xff]  ;;  %v176_v31 = vld [vmem:[%s1463_s1 + $0x28] sm:$0xff]  ;;  %v987_v32 = vld [vmem:[%s1463_s1 + $0x130] sm:$0xff] }
  0x16   : > { %1001 = vmatmul.msk.f32.vlgmr.msra.gmra.mxu2 %vm209_vm0, %v981_v8  ;;  %1037 = vmatmul.msk.f32.vlgmr.msra.gmra.mxu3 %vm209_vm0, %v1017_v9  ;;  %v1023_v33 = vld [vmem:[%s1463_s1 + $0x1b0] sm:$0xff]  ;;  %v988_v36 = vld [vmem:[%s1463_s1 + $0x138] sm:$0xff]  ;;  %v989_v40 = vld [vmem:[%s1463_s1 + $0x140] sm:$0xff] }
  0x17   : > { %947 = vmatmul.msk.f32.vlgmr.msra.gmra.mxu0 %vm209_vm0, %v927_v10  ;;  %965 = vmatmul.msk.f32.vlgmr.msra.gmra.mxu1 %vm209_vm0, %v171_v11  ;;  %v933_v34 = vld [vmem:[%s1463_s1 + $0xb0] sm:$0xff]  ;;  %v1024_v37 = vld [vmem:[%s1463_s1 + $0x1b8] sm:$0xff]  ;;  %v1025_v41 = vld [vmem:[%s1463_s1 + $0x1c0] sm:$0xff] }
  0x18   : > { %v177_v35 = vld [vmem:[%s1463_s1 + $0x30] sm:$0xff]  ;;  %v934_v38 = vld [vmem:[%s1463_s1 + $0xb8] sm:$0xff]  ;;  %v935_v42 = vld [vmem:[%s1463_s1 + $0xc0] sm:$0xff] }
  0x19   : > { %v178_v39 = vld [vmem:[%s1463_s1 + $0x38] sm:$0xff]  ;;  %v179_v43 = vld [vmem:[%s1463_s1 + $0x40] sm:$0xff]  ;;  %v990_v44 = vld [vmem:[%s1463_s1 + $0x148] sm:$0xff] }
  0x1a   : > { %v1026_v45 = vld [vmem:[%s1463_s1 + $0x1c8] sm:$0xff]  ;;  %v991_v48 = vld [vmem:[%s1463_s1 + $0x150] sm:$0xff]  ;;  %v992_v52 = vld [vmem:[%s1463_s1 + $0x158] sm:$0xff] }
  0x1b   : > { %v936_v46 = vld [vmem:[%s1463_s1 + $0xc8] sm:$0xff]  ;;  %v1027_v49 = vld [vmem:[%s1463_s1 + $0x1d0] sm:$0xff]  ;;  %v1028_v53 = vld [vmem:[%s1463_s1 + $0x1d8] sm:$0xff] }
  0x1c   : > { %v180_v47 = vld [vmem:[%s1463_s1 + $0x48] sm:$0xff]  ;;  %v937_v50 = vld [vmem:[%s1463_s1 + $0xd0] sm:$0xff]  ;;  %v938_v54 = vld [vmem:[%s1463_s1 + $0xd8] sm:$0xff] }
  0x1d   : > { %v181_v51 = vld [vmem:[%s1463_s1 + $0x50] sm:$0xff]  ;;  %v182_v55 = vld [vmem:[%s1463_s1 + $0x58] sm:$0xff]  ;;  %v993_v56 = vld [vmem:[%s1463_s1 + $0x160] sm:$0xff] }
  0x1e   : > { %1002 = vmatmul.msk.f32.gmra.mxu2 %vm209_vm0, %v982_v12  ;;  %1038 = vmatmul.msk.f32.gmra.mxu3 %vm209_vm0, %v1018_v13  ;;  %v1029_v57 = vld [vmem:[%s1463_s1 + $0x1e0] sm:$0xff]  ;;  %v994_v60 = vld [vmem:[%s1463_s1 + $0x168] sm:$0xff]  ;;  %v995_v0 = vld [vmem:[%s1463_s1 + $0x170] sm:$0xff] }
  0x1f   : > { %948 = vmatmul.msk.f32.gmra.mxu0 %vm209_vm0, %v928_v14  ;;  %966 = vmatmul.msk.f32.gmra.mxu1 %vm209_vm0, %v172_v15  ;;  %v939_v58 = vld [vmem:[%s1463_s1 + $0xe0] sm:$0xff]  ;;  %v1030_v61 = vld [vmem:[%s1463_s1 + $0x1e8] sm:$0xff]  ;;  %v1031_v1 = vld [vmem:[%s1463_s1 + $0x1f0] sm:$0xff] }
  0x20   : > { %v183_v59 = vld [vmem:[%s1463_s1 + $0x60] sm:$0xff]  ;;  %v940_v62 = vld [vmem:[%s1463_s1 + $0xe8] sm:$0xff]  ;;  %v941_v2 = vld [vmem:[%s1463_s1 + $0xf0] sm:$0xff] }
  0x21   : > { %v184_v63 = vld [vmem:[%s1463_s1 + $0x68] sm:$0xff]  ;;  %v185_v3 = vld [vmem:[%s1463_s1 + $0x70] sm:$0xff]  ;;  %v996_v4 = vld [vmem:[%s1463_s1 + $0x178] sm:$0xff] }
  0x22   : > { %v1032_v5 = vld [vmem:[%s1463_s1 + $0x1f8] sm:$0xff] }
  0x23   : > { %v942_v6 = vld [vmem:[%s1463_s1 + $0xf8] sm:$0xff] }
  0x24   : > { %v186_v7 = vld [vmem:[%s1463_s1 + $0x78] sm:$0xff] }
  0x26   : > { %1003 = vmatmul.msk.f32.gmra.mxu2 %vm209_vm0, %v983_v16  ;;  %1039 = vmatmul.msk.f32.gmra.mxu3 %vm209_vm0, %v1019_v17 }
  0x27   : > { %949 = vmatmul.msk.f32.gmra.mxu0 %vm209_vm0, %v929_v18  ;;  %967 = vmatmul.msk.f32.gmra.mxu1 %vm209_vm0, %v173_v19 }
  0x2e   : > { %1004 = vmatmul.msk.f32.gmra.mxu2 %vm209_vm0, %v984_v20  ;;  %1040 = vmatmul.msk.f32.gmra.mxu3 %vm209_vm0, %v1020_v21 }
  0x2f   : > { %950 = vmatmul.msk.f32.gmra.mxu0 %vm209_vm0, %v930_v22  ;;  %968 = vmatmul.msk.f32.gmra.mxu1 %vm209_vm0, %v174_v23 }
  0x36   : > { %1005 = vmatmul.msk.f32.gmra.mxu2 %vm209_vm0, %v985_v24  ;;  %1041 = vmatmul.msk.f32.gmra.mxu3 %vm209_vm0, %v1021_v25 }
  0x37   : > { %951 = vmatmul.msk.f32.gmra.mxu0 %vm209_vm0, %v931_v26  ;;  %969 = vmatmul.msk.f32.gmra.mxu1 %vm209_vm0, %v175_v27 }
  0x3e   : > { %1006 = vmatmul.msk.f32.gmra.mxu2 %vm209_vm0, %v986_v28  ;;  %1042 = vmatmul.msk.f32.gmra.mxu3 %vm209_vm0, %v1022_v29 }
  0x3f   : > { %952 = vmatmul.msk.f32.gmra.mxu0 %vm209_vm0, %v932_v30  ;;  %970 = vmatmul.msk.f32.gmra.mxu1 %vm209_vm0, %v176_v31 }
  0x46   : > { %1007 = vmatmul.msk.f32.gmra.mxu2 %vm209_vm0, %v987_v32  ;;  %1043 = vmatmul.msk.f32.gmra.mxu3 %vm209_vm0, %v1023_v33 }
  0x47   : > { %953 = vmatmul.msk.f32.gmra.mxu0 %vm209_vm0, %v933_v34  ;;  %971 = vmatmul.msk.f32.gmra.mxu1 %vm209_vm0, %v177_v35 }
  0x4e   : > { %1008 = vmatmul.msk.f32.gmra.mxu2 %vm209_vm0, %v988_v36  ;;  %1044 = vmatmul.msk.f32.gmra.mxu3 %vm209_vm0, %v1024_v37 }
  0x4f   : > { %954 = vmatmul.msk.f32.gmra.mxu0 %vm209_vm0, %v934_v38  ;;  %972 = vmatmul.msk.f32.gmra.mxu1 %vm209_vm0, %v178_v39  ;;  %v799_v38 = vld [vmem:[%s1464_s2 + $0x8] sm:$0xff] }
  0x56   : > { %1009 = vmatmul.msk.f32.gmra.mxu2 %vm209_vm0, %v989_v40  ;;  %1045 = vmatmul.msk.f32.gmra.mxu3 %vm209_vm0, %v1025_v41  ;;  %v1078_v40 = vmov 0  }
  0x57   : > { %955 = vmatmul.msk.f32.gmra.mxu0 %vm209_vm0, %v935_v42  ;;  %973 = vmatmul.msk.f32.gmra.mxu1 %vm209_vm0, %v179_v43 }
  0x58   : > { %1068 = vset.pattern.permute.xlu0 %v1078_v40  ;;  %1069 = vset.pattern.permute.xlu1 %v1078_v40 }
  0x59   : > { %813 = vperm.xlu0 %1068, %v799_v38   ;;  %1067 = vset.pattern.permute.xlu2 %v1078_v40 }
  0x5e   : > { %1010 = vmatmul.msk.f32.gmra.mxu2 %vm209_vm0, %v990_v44  ;;  %1046 = vmatmul.msk.f32.gmra.mxu3 %vm209_vm0, %v1026_v45 }
  0x5f   : > { %956 = vmatmul.msk.f32.gmra.mxu0 %vm209_vm0, %v936_v46  ;;  %974 = vmatmul.msk.f32.gmra.mxu1 %vm209_vm0, %v180_v47  ;;  %v800_v47 = vld [vmem:[%s1464_s2 + $0x10] sm:$0xff] }
  0x60   : > { %818 = vperm.xlu1 %1069, %v800_v47  }
  0x66   : > { %1011 = vmatmul.msk.f32.gmra.mxu2 %vm209_vm0, %v991_v48  ;;  %1047 = vmatmul.msk.f32.gmra.mxu3 %vm209_vm0, %v1027_v49 }
  0x67   : > { %957 = vmatmul.msk.f32.gmra.mxu0 %vm209_vm0, %v937_v50  ;;  %975 = vmatmul.msk.f32.gmra.mxu1 %vm209_vm0, %v181_v51 }
  0x6e   : > { %1012 = vmatmul.msk.f32.gmra.mxu2 %vm209_vm0, %v992_v52  ;;  %1048 = vmatmul.msk.f32.gmra.mxu3 %vm209_vm0, %v1028_v53 }
  0x6f   : > { %958 = vmatmul.msk.f32.gmra.mxu0 %vm209_vm0, %v938_v54  ;;  %976 = vmatmul.msk.f32.gmra.mxu1 %vm209_vm0, %v182_v55  ;;  %v802_v55 = vld [vmem:[%s1464_s2 + $0x20] sm:$0xff] }
  0x70   : > { %828 = vperm.xlu1 %1069, %v802_v55  }
  0x76   : > { %1013 = vmatmul.msk.f32.gmra.mxu2 %vm209_vm0, %v993_v56  ;;  %1049 = vmatmul.msk.f32.gmra.mxu3 %vm209_vm0, %v1029_v57 }
  0x77   : > { %959 = vmatmul.msk.f32.gmra.mxu0 %vm209_vm0, %v939_v58  ;;  %977 = vmatmul.msk.f32.gmra.mxu1 %vm209_vm0, %v183_v59 }
  0x7e   : > { %1014 = vmatmul.msk.f32.gmra.mxu2 %vm209_vm0, %v994_v60  ;;  %1050 = vmatmul.msk.f32.gmra.mxu3 %vm209_vm0, %v1030_v61 }
  0x7f   : > { %960 = vmatmul.msk.f32.gmra.mxu0 %vm209_vm0, %v940_v62  ;;  %978 = vmatmul.msk.f32.gmra.mxu1 %vm209_vm0, %v184_v63  ;;  %v798_v63 = vld [vmem:[%s1464_s2] sm:$0xff] }
  0x80   : > { %808 = vperm.xlu2 %1067, %v798_v63  }
  0x86   : > { %1015 = vmatmul.msk.f32.gmra.mxu2 %vm209_vm0, %v995_v0  ;;  %1051 = vmatmul.msk.f32.gmra.mxu3 %vm209_vm0, %v1031_v1 }
  0x87   : > { %961 = vmatmul.msk.f32.gmra.mxu0 %vm209_vm0, %v941_v2  ;;  %979 = vmatmul.msk.f32.gmra.mxu1 %vm209_vm0, %v185_v3 }
  0x8e   : > { %1016 = vmatmul.msk.f32.gmra.mxu2 %vm209_vm0, %v996_v4  ;;  %1052 = vmatmul.msk.f32.gmra.mxu3 %vm209_vm0, %v1032_v5 }
  0x8f   : > { %962 = vmatmul.msk.f32.gmra.mxu0 %vm209_vm0, %v942_v6  ;;  %980 = vmatmul.msk.f32.gmra.mxu1 %vm209_vm0, %v186_v7  ;;  %v801_v7 = vld [vmem:[%s1464_s2 + $0x18] sm:$0xff] }
  0x90   : > { %823 = vperm.xlu2 %1067, %v801_v7  }
  0x94   : > { %v281_v8 = vpop.f32.mrf.mxu0  ;;  %v400_v9 = vpop.f32.mrf.mxu1 }
  0x95   : > { %v401_v10 = vadd.f32 %v400_v9, %v281_v8 }
  0x99   : > { %v539_v11 = vpop.f32.mrf.mxu2  ;;  %v694_v12 = vpop.f32.mrf.mxu3 }
  0x9a   : > { %v587_v13 = vadd.f32 %v539_v11, %v401_v10 }
  0x9c   : > { %v1380_v14 = vadd.f32 %v694_v12, %v587_v13  ;;  %v284_v15 = vpop.f32.mrf.mxu0  ;;  %v403_v16 = vpop.f32.mrf.mxu1 }
  0x9d   : > { %v404_v17 = vadd.f32 %v403_v16, %v284_v15 }
  0xa1   : > { %v542_v18 = vpop.f32.mrf.mxu2  ;;  %v697_v19 = vpop.f32.mrf.mxu3 }
  0xa2   : > { %v588_v20 = vadd.f32 %v542_v18, %v404_v17 }
  0xa4   : > { %v1382_v21 = vadd.f32 %v697_v19, %v588_v20  ;;  %v287_v22 = vpop.f32.mrf.mxu0  ;;  %v406_v23 = vpop.f32.mrf.mxu1 }
  0xa5   : > { %v407_v24 = vadd.f32 %v406_v23, %v287_v22 }
  0xa9   : > { %v545_v25 = vpop.f32.mrf.mxu2  ;;  %v700_v26 = vpop.f32.mrf.mxu3 }
  0xaa   : > { %v589_v27 = vadd.f32 %v545_v25, %v407_v24 }
  0xac   : > { %v1384_v28 = vadd.f32 %v700_v26, %v589_v27  ;;  %v290_v29 = vpop.f32.mrf.mxu0  ;;  %v409_v30 = vpop.f32.mrf.mxu1 }
  0xad   : > { %v410_v31 = vadd.f32 %v409_v30, %v290_v29 }
  0xb1   : > { %v548_v32 = vpop.f32.mrf.mxu2  ;;  %v703_v33 = vpop.f32.mrf.mxu3 }
  0xb2   : > { %v590_v34 = vadd.f32 %v548_v32, %v410_v31 }
  0xb4   : > { %v1386_v35 = vadd.f32 %v703_v33, %v590_v34  ;;  %v293_v36 = vpop.f32.mrf.mxu0  ;;  %v412_v37 = vpop.f32.mrf.mxu1 }
  0xb5   : > { %v413_v39 = vadd.f32 %v412_v37, %v293_v36 }
  0xb9   : > { %v551_v41 = vpop.f32.mrf.mxu2  ;;  %v706_v42 = vpop.f32.mrf.mxu3 }
  0xba   : > { %v591_v43 = vadd.f32 %v551_v41, %v413_v39 }
  0xbc   : > { %v1391_v44 = vadd.f32 %v706_v42, %v591_v43  ;;  %v296_v45 = vpop.f32.mrf.mxu0  ;;  %v415_v46 = vpop.f32.mrf.mxu1 }
  0xbd   : > { %v416_v48 = vadd.f32 %v415_v46, %v296_v45 }
  0xc1   : > { %v554_v49 = vpop.f32.mrf.mxu2  ;;  %v709_v50 = vpop.f32.mrf.mxu3 }
  0xc2   : > { %v592_v51 = vadd.f32 %v554_v49, %v416_v48 }
  0xc4   : > { %v1396_v52 = vadd.f32 %v709_v50, %v592_v51  ;;  %v299_v53 = vpop.f32.mrf.mxu0  ;;  %v418_v54 = vpop.f32.mrf.mxu1 }
  0xc5   : > { %v419_v56 = vadd.f32 %v418_v54, %v299_v53 }
  0xc9   : > { %v557_v57 = vpop.f32.mrf.mxu2  ;;  %v712_v58 = vpop.f32.mrf.mxu3 }
  0xca   : > { %v593_v59 = vadd.f32 %v557_v57, %v419_v56 }
  0xcc   : > { %v1401_v60 = vadd.f32 %v712_v58, %v593_v59  ;;  %v302_v61 = vpop.f32.mrf.mxu0  ;;  %v421_v62 = vpop.f32.mrf.mxu1 }
  0xcd   : > { %v422_v0 = vadd.f32 %v421_v62, %v302_v61  ;;  %v803_v61 = vld [vmem:[%s1464_s2 + $0x28] sm:$0xff] }
  0xd1   : > { %v560_v1 = vpop.f32.mrf.mxu2  ;;  %v715_v2 = vpop.f32.mrf.mxu3 }
  0xd2   : > { %v594_v3 = vadd.f32 %v560_v1, %v422_v0 }
  0xd4   : > { %v1406_v4 = vadd.f32 %v715_v2, %v594_v3  ;;  %v305_v5 = vpop.f32.mrf.mxu0  ;;  %v424_v6 = vpop.f32.mrf.mxu1 }
  0xd5   : > { %v425_v8 = vadd.f32 %v424_v6, %v305_v5  ;;  %v804_v6 = vld [vmem:[%s1464_s2 + $0x30] sm:$0xff] }
  0xd9   : > { %v563_v9 = vpop.f32.mrf.mxu2  ;;  %v718_v10 = vpop.f32.mrf.mxu3 }
  0xda   : > { %v595_v11 = vadd.f32 %v563_v9, %v425_v8  ;;  %v805_v8 = vld [vmem:[%s1464_s2 + $0x38] sm:$0xff]  ;;  %v809_v9 = vpop.permute.xlu2 %808 }
  0xdc   : > { %v750_v12 = vadd.f32 %v718_v10, %v595_v11  ;;  %v308_v13 = vpop.f32.mrf.mxu0  ;;  %v427_v15 = vpop.f32.mrf.mxu1 }
  0xdd   : > { %v428_v16 = vadd.f32 %v427_v15, %v308_v13  ;;  %v814_v10 = vpop.permute.xlu0 %813  ;;  %v819_v11 = vpop.permute.xlu1 %818 }
  0xde   : > { %766 = vrot.lane.b32.xlu0 %v750_v12, %s1079_s9 }
  0xe1   : > { %v566_v17 = vpop.f32.mrf.mxu2  ;;  %v721_v18 = vpop.f32.mrf.mxu3 }
  0xe2   : > { %v596_v19 = vadd.f32 %v566_v17, %v428_v16 }
  0xe4   : > { %v751_v20 = vadd.f32 %v721_v18, %v596_v19  ;;  %v311_v22 = vpop.f32.mrf.mxu0  ;;  %v430_v23 = vpop.f32.mrf.mxu1 }
  0xe5   : > { %v431_v24 = vadd.f32 %v430_v23, %v311_v22  ;;  %v829_v17 = vpop.permute.xlu1 %828 }
  0xe6   : > { %768 = vrot.lane.b32.xlu0 %v751_v20, %s1079_s9 }
  0xe9   : > { %v569_v25 = vpop.f32.mrf.mxu2  ;;  %v724_v26 = vpop.f32.mrf.mxu3 }
  0xea   : > { %v597_v27 = vadd.f32 %v569_v25, %v431_v24  ;;  %v824_v12 = vpop.permute.xlu2 %823 }
  0xec   : > { %v752_v29 = vadd.f32 %v724_v26, %v597_v27  ;;  %v314_v30 = vpop.f32.mrf.mxu0  ;;  %v433_v31 = vpop.f32.mrf.mxu1 }
  0xed   : > { %v434_v32 = vadd.f32 %v433_v31, %v314_v30 }
  0xee   : > { %770 = vrot.lane.b32.xlu1 %v752_v29, %s1079_s9 }
  0xf1   : > { %v572_v33 = vpop.f32.mrf.mxu2  ;;  %v727_v34 = vpop.f32.mrf.mxu3 }
  0xf2   : > { %v598_v36 = vadd.f32 %v572_v33, %v434_v32 }
  0xf4   : > { %v753_v37 = vadd.f32 %v727_v34, %v598_v36  ;;  %v317_v38 = vpop.f32.mrf.mxu0  ;;  %v436_v39 = vpop.f32.mrf.mxu1 }
  0xf5   : > { %v437_v40 = vadd.f32 %v436_v39, %v317_v38 }
  0xf6   : > { %772 = vrot.lane.b32.xlu1 %v753_v37, %s1079_s9 }
  0xf9   : > { %v575_v41 = vpop.f32.mrf.mxu2  ;;  %v730_v42 = vpop.f32.mrf.mxu3 }
  0xfa   : > { %v599_v43 = vadd.f32 %v575_v41, %v437_v40 }
  0xfc   : > { %v754_v45 = vadd.f32 %v730_v42, %v599_v43  ;;  %v320_v46 = vpop.f32.mrf.mxu0  ;;  %v439_v47 = vpop.f32.mrf.mxu1 }
  0xfd   : > { %v440_v48 = vadd.f32 %v439_v47, %v320_v46 }
  0xfe   : > { %774 = vrot.lane.b32.xlu2 %v754_v45, %s1079_s9 }
 0x101   : > { %v578_v49 = vpop.f32.mrf.mxu2  ;;  %v733_v50 = vpop.f32.mrf.mxu3 }
 0x102   : > { %v600_v51 = vadd.f32 %v578_v49, %v440_v48 }
 0x104   : > { %v755_v53 = vadd.f32 %v733_v50, %v600_v51  ;;  %v323_v54 = vpop.f32.mrf.mxu0  ;;  %v442_v55 = vpop.f32.mrf.mxu1 }
 0x105   : > { %v443_v56 = vadd.f32 %v442_v55, %v323_v54 }
 0x106   : > { %776 = vrot.lane.b32.xlu2 %v755_v53, %s1079_s9 }
 0x109   : > { %v581_v57 = vpop.f32.mrf.mxu2  ;;  %v736_v58 = vpop.f32.mrf.mxu3 }
 0x10a   : > { %v601_v59 = vadd.f32 %v581_v57, %v443_v56 }
 0x10c   : > { %v756_v62 = vadd.f32 %v736_v58, %v601_v59  ;;  %v326_v63 = vpop.f32.mrf.mxu0  ;;  %v445_v0 = vpop.f32.mrf.mxu1 }
 0x10d   : > { %v446_v1 = vadd.f32 %v445_v0, %v326_v63 }
 0x10e   : > { %833 = vperm.xlu2 %1067, %v803_v61   ;;  %778 = vrot.lane.b32.xlu0 %v756_v62, %s1079_s9 }
 0x111   : > { %v584_v2 = vpop.f32.mrf.mxu2  ;;  %v739_v3 = vpop.f32.mrf.mxu3 }
 0x112   : > { %v602_v5 = vadd.f32 %v584_v2, %v446_v1 }
 0x114   : > { %v757_v7 = vadd.f32 %v739_v3, %v602_v5 }
 0x116   : > { %780 = vrot.lane.b32.xlu1 %v757_v7, %s1079_s9  ;;  %838 = vperm.xlu0 %1068, %v804_v6  }
 0x11e   : > { %843 = vperm.xlu1 %1069, %v805_v8  }
 0x150   : > { %v767_v13 = vpop.permute.xlu0 %766 }
 0x151   : > { %v790_v15 = vadd.f32 %v767_v13, %v1380_v14 }
 0x153   : > { %v846_v16 = vadd.f32 %v809_v9, %v790_v15 }
 0x155   : > { %855 = vst.msk [vmem:[%s1434_s21] sm:$0xff] %vm854_vm1, %v846_v16 }
 0x158   : > { %v775_v18 = vpop.permute.xlu2 %774  ;;  %v769_v19 = vpop.permute.xlu0 %768 }
 0x159   : > { %v794_v20 = vadd.f32 %v775_v18, %v1391_v44  ;;  %v791_v14 = vadd.f32 %v769_v19, %v1382_v21 }
 0x15b   : > { %v850_v22 = vadd.f32 %v829_v17, %v794_v20  ;;  %v847_v23 = vadd.f32 %v814_v10, %v791_v14 }
 0x15d   : > { %859 = vst.msk [vmem:[%s1434_s21 + $0x20] sm:$0xff] %vm854_vm1, %v850_v22 }
 0x15e   : > { %856 = vst.msk [vmem:[%s1434_s21 + $0x8] sm:$0xff] %vm854_vm1, %v847_v23 }
 0x160   : > { %v777_v24 = vpop.permute.xlu2 %776  ;;  %v771_v25 = vpop.permute.xlu1 %770 }
 0x161   : > { %v792_v26 = vadd.f32 %v771_v25, %v1384_v28  ;;  %v795_v44 = vadd.f32 %v777_v24, %v1396_v52 }
 0x163   : > { %v848_v27 = vadd.f32 %v819_v11, %v792_v26 }
 0x165   : > { %857 = vst.msk [vmem:[%s1434_s21 + $0x10] sm:$0xff] %vm854_vm1, %v848_v27 }
 0x168   : > { %v834_v29 = vpop.permute.xlu2 %833  ;;  %v773_v21 = vpop.permute.xlu1 %772 }
 0x169   : > { %v851_v30 = vadd.f32 %v834_v29, %v795_v44  ;;  %v793_v31 = vadd.f32 %v773_v21, %v1386_v35 }
 0x16b   : > { %860 = vst.msk [vmem:[%s1434_s21 + $0x28] sm:$0xff] %vm854_vm1, %v851_v30  ;;  %v849_v32 = vadd.f32 %v824_v12, %v793_v31 }
 0x16d   : > { %858 = vst.msk [vmem:[%s1434_s21 + $0x18] sm:$0xff] %vm854_vm1, %v849_v32 }
 0x180   : > { %v779_v33 = vpop.permute.xlu0 %778 }
 0x181   : > { %v796_v28 = vadd.f32 %v779_v33, %v1401_v60 }
 0x188   : > { %v781_v34 = vpop.permute.xlu1 %780  ;;  %v839_v36 = vpop.permute.xlu0 %838 }
 0x189   : > { %v852_v37 = vadd.f32 %v839_v36, %v796_v28  ;;  %v797_v52 = vadd.f32 %v781_v34, %v1406_v4 }
 0x18b   : > { %861 = vst.msk [vmem:[%s1434_s21 + $0x30] sm:$0xff] %vm854_vm1, %v852_v37 }
 0x190   : > { %v844_v38 = vpop.permute.xlu1 %843 }
 0x191   : > { %v853_v39 = vadd.f32 %v844_v38, %v797_v52 }
 0x193   : > { %862 = vst.msk [vmem:[%s1434_s21 + $0x38] sm:$0xff] %vm854_vm1, %v853_v39 }
 0x194 PF: > { %s13_s12 = sadd.s32 1, %s1076_s12  }
 0x195   : > { %p10_p4 = scmp.ge.s32.totalorder %s13_s12, 4  }
 0x197   :  { %12 = sbr.rel (!%p10_p4) target bundleno = 1 (0x1), region = 68 }

</bundles_post_ra>
